<compile_context>
chip_gen: v6e
topology: v6e:2x2x1
jax: 0.10.0
libtpu: 0.0.40
codegen_flags: <defaults>
</compile_context>

<pallas_src>
import functools

import jax
import jax.numpy as jnp
from jax.experimental import pallas as pl
from jax.experimental.pallas import tpu as pltpu


def _contrastive_loss_kernel(x1_ref, x2_ref, x3_ref, y_ref, out_ref, *,
                             margin, batch, block_rows):
    i = pl.program_id(0)

    # Load native-dtype tiles; cast to f32 on the VPU (hidden under the DMA).
    x1 = x1_ref[...].astype(jnp.float32)
    x2 = x2_ref[...].astype(jnp.float32)
    x3 = x3_ref[...].astype(jnp.float32)

    # y lives whole in VMEM (padded to num_tiles*block_rows rows, zeros past B);
    # slice this tile's rows -- no per-step DMA for y.
    start = pl.multiple_of(i * block_rows, block_rows)
    y = y_ref[pl.ds(start, block_rows), :]                       # (TB, 1) f32

    # Validity mask for the ragged final batch tile.
    row_ids = i * block_rows + jax.lax.broadcasted_iota(
        jnp.int32, (block_rows, 1), 0)
    valid = row_ids < batch                                      # (TB, 1) bool

    d_pos = x1 - x2
    pos_sq = jnp.sum(d_pos * d_pos, axis=1, keepdims=True)       # ||x1-x2||^2
    pos_sq = jnp.where(valid, pos_sq, 0.0)

    d_neg = x1 - x3
    neg_sq = jnp.sum(d_neg * d_neg, axis=1, keepdims=True)       # ||x1-x3||^2
    neg_sq = jnp.where(valid, neg_sq, 0.0)    # mask garbage BEFORE sqrt (NaN-safe)
    neg_dist = jnp.sqrt(neg_sq)               # EUP slot (free in this mem-bound kernel)

    hinge = jnp.maximum(margin - neg_dist, 0.0)
    loss = 0.5 * (1.0 - y) * pos_sq + 0.5 * y * hinge * hinge    # (TB, 1)
    loss = jnp.where(valid, loss, 0.0)

    # Per-tile partial sum, written into a lane-aligned (1, 8, 128) tile.
    partial = jnp.sum(loss, axis=0, keepdims=True)               # (1, 1)
    out_ref[...] = jnp.broadcast_to(partial, (1, 8, 128))


def _vmem_plan():
    """Generation-aware (vmem_limit_bytes, tile working-set budget)."""
    phys = None
    try:
        info = pltpu.get_tpu_info()
        phys = int(getattr(info, "vmem_capacity_bytes", 0)) or None
    except Exception:
        phys = None
    if phys is None:
        phys = 64 << 20                     # conservative: assume v7x-class VMEM
    if phys >= (128 << 20):                 # v5e / v6e: 128 MiB physical
        return 96 << 20, 56 << 20
    return 40 << 20, 24 << 20               # v7x-class: 64 MiB physical


def _pick_block_rows(batch, feat, itemsize, budget_bytes):
    """Largest 32-aligned batch tile whose working set fits the VMEM budget.

    Working set per tile row:
      3 input streams, double-buffered, in their native dtype
    + 3 f32 materializations inside the kernel (the .astype copies).
    """
    per_row = 3 * 2 * feat * itemsize + 3 * feat * 4
    tb = int(budget_bytes // max(per_row, 1))

    if tb >= batch:
        if batch >= 128:
            # Split into two balanced tiles: v7x gets one per TensorCore and
            # the prefetch/writeback pipeline stays alive.
            half = (batch + 1) // 2
            return min(batch, ((half + 31) // 32) * 32)
        return batch                         # tiny batch: one full-extent block

    # Round down to a 32-sublane multiple (covers f32/bf16/int8 packing).
    return max(32, (tb // 32) * 32)


def contrastive_loss(x1, x2, x3, y, margin=1.0, block_rows=None):
    """Pallas TPU implementation of ContrastiveLoss.forward (returns scalar sum)."""
    B, D = x1.shape
    itemsize = jnp.dtype(x1.dtype).itemsize

    vmem_limit, budget = _vmem_plan()
    if block_rows is None:
        block_rows = _pick_block_rows(B, D, itemsize, budget)
    block_rows = int(min(block_rows, B))
    num_tiles = pl.cdiv(B, block_rows)

    # y: whole-array VMEM resident, padded so in-kernel slicing never reads OOB.
    padded_rows = num_tiles * block_rows
    y2d = jnp.pad(y.astype(jnp.float32).reshape(B, 1),
                  ((0, padded_rows - B), (0, 0)))

    kernel = functools.partial(
        _contrastive_loss_kernel,
        margin=float(margin), batch=B, block_rows=block_rows)

    cost = pl.CostEstimate(
        flops=8 * B * D,
        transcendentals=B,                            # one sqrt per row
        bytes_accessed=3 * B * D * itemsize
        + padded_rows * 4
        + num_tiles * 8 * 128 * 4,
    )

    partials = pl.pallas_call(
        kernel,
        out_shape=jax.ShapeDtypeStruct((num_tiles, 8, 128), jnp.float32),
        grid=(num_tiles,),
        in_specs=[
            pl.BlockSpec((block_rows, D), lambda i: (i, 0)),
            pl.BlockSpec((block_rows, D), lambda i: (i, 0)),
            pl.BlockSpec((block_rows, D), lambda i: (i, 0)),
            # y loaded once into VMEM for the whole grid (no per-step DMA).
            pl.BlockSpec(memory_space=pltpu.MemorySpace.VMEM),
        ],
        out_specs=pl.BlockSpec((1, 8, 128), lambda i: (i, 0, 0)),
        compiler_params=pltpu.CompilerParams(
            dimension_semantics=("parallel",),
            vmem_limit_bytes=vmem_limit,
        ),
        cost_estimate=cost,
    )(x1, x2, x3, y2d)

    # One partial per tile lives at [:, 0, 0]; final reduce is tiny, done in XLA.
    return jnp.sum(partials[:, 0, 0])


def _reference(x1, x2, x3, y, margin=1.0):
    pd = jnp.linalg.norm(x1 - x2, ord=2, axis=1)
    nd = jnp.linalg.norm(x1 - x3, ord=2, axis=1)
    loss = 0.5 * (1 - y) * pd**2 + 0.5 * y * jnp.maximum(margin - nd, 0.0) ** 2
    return jnp.sum(loss)


if __name__ == "__main__":
    key = jax.random.PRNGKey(0)
    k1, k2, k3, k4 = jax.random.split(key, 4)

    # Small shapes consistent with the module: batch=8, hidden=32.
    B, D = 8, 32
    x1 = jax.random.normal(k1, (B, D), dtype=jnp.float32)
    x2 = jax.random.normal(k2, (B, D), dtype=jnp.float32)
    x3 = jax.random.normal(k3, (B, D), dtype=jnp.float32)
    y = jax.random.bernoulli(k4, 0.5, (B,)).astype(jnp.float32)

    out = jax.block_until_ready(contrastive_loss(x1, x2, x3, y, margin=1.0))
    ref = jax.block_until_ready(_reference(x1, x2, x3, y, margin=1.0))
    assert jnp.allclose(out, ref, rtol=1e-5, atol=1e-4), (out, ref)

    # Multi-tile + ragged-last-tile masking path (explicit small block).
    B2, D2 = 20, 256
    k5, k6, k7, k8 = jax.random.split(jax.random.PRNGKey(1), 4)
    a1 = jax.random.normal(k5, (B2, D2), dtype=jnp.float32)
    a2 = jax.random.normal(k6, (B2, D2), dtype=jnp.float32)
    a3 = jax.random.normal(k7, (B2, D2), dtype=jnp.float32)
    yy = jax.random.bernoulli(k8, 0.5, (B2,)).astype(jnp.float32)

    out2 = jax.block_until_ready(
        contrastive_loss(a1, a2, a3, yy, margin=1.0, block_rows=8))
    ref2 = jax.block_until_ready(_reference(a1, a2, a3, yy, margin=1.0))
    assert jnp.allclose(out2, ref2, rtol=1e-5, atol=1e-3), (out2, ref2)

    # Auto-picked tiling path: B>=128 forces a 2-tile split (ragged 2nd tile).
    B3, D3 = 160, 128
    k9, k10, k11, k12 = jax.random.split(jax.random.PRNGKey(2), 4)
    b1 = jax.random.normal(k9, (B3, D3), dtype=jnp.float32)
    b2 = jax.random.normal(k10, (B3, D3), dtype=jnp.float32)
    b3 = jax.random.normal(k11, (B3, D3), dtype=jnp.float32)
    yz = jax.random.bernoulli(k12, 0.5, (B3,)).astype(jnp.float32)

    out3 = jax.block_until_ready(contrastive_loss(b1, b2, b3, yz, margin=1.0))
    ref3 = jax.block_until_ready(_reference(b1, b2, b3, yz, margin=1.0))
    assert jnp.allclose(out3, ref3, rtol=1e-5, atol=1e-3), (out3, ref3)

    print("KERNEL_OK")
</pallas_src>

<mosaic_0001>
module attributes {stable_mosaic.version = 11 : i64} {
  func.func @_contrastive_loss_kernel(%arg0: i32, %arg1: memref<8x32xf32, #tpu.memory_space<vmem>>, %arg2: memref<8x32xf32, #tpu.memory_space<vmem>>, %arg3: memref<8x32xf32, #tpu.memory_space<vmem>>, %arg4: memref<8x1xf32, #tpu.memory_space<vmem>>, %arg5: memref<1x8x128xf32, #tpu.memory_space<vmem>>) attributes {dimension_semantics = [#tpu.dimension_semantics<parallel>], iteration_bounds = array<i64: 1>, scalar_prefetch = 0 : i64, scratch_operands = 0 : i64, tpu.core_type = #tpu.core_type<tc>, window_params = [{transform_indices = @transform_0, window_bounds = array<i64: 8, 32>}, {transform_indices = @transform_1, window_bounds = array<i64: 8, 32>}, {transform_indices = @transform_2, window_bounds = array<i64: 8, 32>}, {pipeline_mode = #tpu.pipeline_mode<synchronous>, transform_indices = @transform_3, window_bounds = array<i64: 8, 1>}, {transform_indices = @transform_4, window_bounds = array<i64: 1, 8, 128>}]} {
    %c0 = arith.constant 0 : index
    %c0_0 = arith.constant 0 : index
    %0 = vector.load %arg1[%c0, %c0_0] : memref<8x32xf32, #tpu.memory_space<vmem>>, vector<8x32xf32>
    %c0_1 = arith.constant 0 : index
    %c0_2 = arith.constant 0 : index
    %1 = vector.load %arg2[%c0_1, %c0_2] : memref<8x32xf32, #tpu.memory_space<vmem>>, vector<8x32xf32>
    %c0_3 = arith.constant 0 : index
    %c0_4 = arith.constant 0 : index
    %2 = vector.load %arg3[%c0_3, %c0_4] : memref<8x32xf32, #tpu.memory_space<vmem>>, vector<8x32xf32>
    %c8_i32 = arith.constant 8 : i32
    %3 = arith.muli %arg0, %c8_i32 : i32
    %4 = tpu.assume_multiple %3, 8 : i32
    %5 = arith.index_cast %4 : i32 to index
    %c0_5 = arith.constant 0 : index
    %6 = vector.load %arg4[%5, %c0_5] : memref<8x1xf32, #tpu.memory_space<vmem>>, vector<8x1xf32>
    %c8_i32_6 = arith.constant 8 : i32
    %7 = arith.muli %arg0, %c8_i32_6 : i32
    %8 = tpu.iota {dimensions = array<i32: 0>} : vector<8x1xi32>
    %9 = vector.broadcast %7 : i32 to vector<8x1xi32>
    %10 = arith.addi %9, %8 : vector<8x1xi32>
    %c8_i32_7 = arith.constant 8 : i32
    %11 = vector.broadcast %c8_i32_7 : i32 to vector<8x1xi32>
    %12 = arith.cmpi slt, %10, %11 : vector<8x1xi32>
    %13 = arith.subf %0, %1 : vector<8x32xf32>
    %14 = arith.mulf %13, %13 : vector<8x32xf32>
    %cst = arith.constant dense<0.000000e+00> : vector<8xf32>
    %15 = vector.multi_reduction <add>, %14, %cst [1] : vector<8x32xf32> to vector<8xf32>
    %16 = vector.shape_cast %15 : vector<8xf32> to vector<8x1xf32>
    %cst_8 = arith.constant 0.000000e+00 : f32
    %17 = vector.broadcast %cst_8 : f32 to vector<8x1xf32>
    %18 = arith.select %12, %16, %17 : vector<8x1xi1>, vector<8x1xf32>
    %19 = arith.subf %0, %2 : vector<8x32xf32>
    %20 = arith.mulf %19, %19 : vector<8x32xf32>
    %cst_9 = arith.constant dense<0.000000e+00> : vector<8xf32>
    %21 = vector.multi_reduction <add>, %20, %cst_9 [1] : vector<8x32xf32> to vector<8xf32>
    %22 = vector.shape_cast %21 : vector<8xf32> to vector<8x1xf32>
    %cst_10 = arith.constant 0.000000e+00 : f32
    %23 = vector.broadcast %cst_10 : f32 to vector<8x1xf32>
    %24 = arith.select %12, %22, %23 : vector<8x1xi1>, vector<8x1xf32>
    %25 = math.sqrt %24 : vector<8x1xf32>
    %cst_11 = arith.constant 1.000000e+00 : f32
    %26 = vector.broadcast %cst_11 : f32 to vector<8x1xf32>
    %27 = arith.subf %26, %25 : vector<8x1xf32>
    %cst_12 = arith.constant 0.000000e+00 : f32
    %28 = vector.broadcast %cst_12 : f32 to vector<8x1xf32>
    %29 = arith.maximumf %27, %28 : vector<8x1xf32>
    %cst_13 = arith.constant 1.000000e+00 : f32
    %30 = vector.broadcast %cst_13 : f32 to vector<8x1xf32>
    %31 = arith.subf %30, %6 : vector<8x1xf32>
    %cst_14 = arith.constant 5.000000e-01 : f32
    %32 = vector.broadcast %cst_14 : f32 to vector<8x1xf32>
    %33 = arith.mulf %32, %31 : vector<8x1xf32>
    %34 = arith.mulf %33, %18 : vector<8x1xf32>
    %cst_15 = arith.constant 5.000000e-01 : f32
    %35 = vector.broadcast %cst_15 : f32 to vector<8x1xf32>
    %36 = arith.mulf %35, %6 : vector<8x1xf32>
    %37 = arith.mulf %36, %29 : vector<8x1xf32>
    %38 = arith.mulf %37, %29 : vector<8x1xf32>
    %39 = arith.addf %34, %38 : vector<8x1xf32>
    %cst_16 = arith.constant 0.000000e+00 : f32
    %40 = vector.broadcast %cst_16 : f32 to vector<8x1xf32>
    %41 = arith.select %12, %39, %40 : vector<8x1xi1>, vector<8x1xf32>
    %cst_17 = arith.constant dense<0.000000e+00> : vector<1xf32>
    %42 = vector.multi_reduction <add>, %41, %cst_17 [0] : vector<8x1xf32> to vector<1xf32>
    %43 = vector.shape_cast %42 : vector<1xf32> to vector<1x1xf32>
    %44 = vector.shape_cast %43 : vector<1x1xf32> to vector<1x1x1xf32>
    %45 = vector.broadcast %44 : vector<1x1x1xf32> to vector<1x8x128xf32>
    %c0_18 = arith.constant 0 : index
    %c0_19 = arith.constant 0 : index
    %c0_20 = arith.constant 0 : index
    %46 = vector.load %arg5[%c0_18, %c0_19, %c0_20] : memref<1x8x128xf32, #tpu.memory_space<vmem>>, vector<1x8x128xf32>
    tpu.vector_store %arg5[%c0_18, %c0_19, %c0_20], %45 {strides = array<i32>} : memref<1x8x128xf32, #tpu.memory_space<vmem>>, vector<1x8x128xf32>,
    return
  }
  func.func @transform_0(%arg0: i32) -> (i32, i32) {
    %c0_i32 = arith.constant 0 : i32
    %c0_i32_0 = arith.constant 0 : i32
    return %arg0, %c0_i32 : i32, i32
  }
  func.func @transform_1(%arg0: i32) -> (i32, i32) {
    %c0_i32 = arith.constant 0 : i32
    %c0_i32_0 = arith.constant 0 : i32
    return %arg0, %c0_i32 : i32, i32
  }
  func.func @transform_2(%arg0: i32) -> (i32, i32) {
    %c0_i32 = arith.constant 0 : i32
    %c0_i32_0 = arith.constant 0 : i32
    return %arg0, %c0_i32 : i32, i32
  }
  func.func @transform_3(%arg0: i32) -> (i32, i32) {
    %c0_i32 = arith.constant 0 : i32
    %c0_i32_0 = arith.constant 0 : i32
    %c0_i32_1 = arith.constant 0 : i32
    return %c0_i32, %c0_i32_0 : i32, i32
  }
  func.func @transform_4(%arg0: i32) -> (i32, i32, i32) {
    %c0_i32 = arith.constant 0 : i32
    %c0_i32_0 = arith.constant 0 : i32
    %c0_i32_1 = arith.constant 0 : i32
    return %arg0, %c0_i32, %c0_i32_0 : i32, i32, i32
  }
}

</mosaic_0001>

<bundles_post_ra>
// kernel: tpu_custom_call.1
= control target key start
LH: loop header
LB: loop body
LE: loop exit
PB: predicated region body
PF: predicated region fallthrough
CT: control target
= control target key end

     0   :  { %9 = vsyncpa [#allocation3], 0  ;;  %s231_s0 = inlined_call_operand.vmem [shape: f32[8,32], index: 0, kind: input, shape index: {}]   ;;  %s232_s1 = inlined_call_operand.hbm [shape: f32[8,32], index: 1, kind: input, shape index: {}]   ;;  %s233_s2 = inlined_call_operand.hbm [shape: f32[8,32], index: 2, kind: input, shape index: {}]   ;;  %s234_s3 = inlined_call_operand.vmem [shape: f32[8,1], index: 3, kind: input, shape index: {}]   ;;  %s235_s4 = inlined_call_operand.hbm [shape: f32[1,8,128], index: 4, kind: output, shape index: {}]  }
   0x1   :  { %10 = vsyncpa [#allocation6], 0 }
   0x2   :  { %11 = vsyncpa [#allocation4], 0  ;;  %s187_s15 = smov [#allocation2]   ;;  %s188_s17 = smov [#allocation5]  }
   0x3   :  { %s20_s16 = sshll.u32 %s187_s15, 4  ;;  %s30_s18 = sshll.u32 %s188_s17, 4  ;;  %s21_s16 = int_to_ptr.vmem [resolvable:$true] %s20_s16  ;;  %s31_s18 = int_to_ptr.vmem [resolvable:$true] %s30_s18 }
   0x4   :  { %s129_s19 = scalar_lea.vmem %s21_s16, 128  ;;  %p134_p1 = scmp.lt.s32.totalorder %s21_s16, %s21_s16 }
   0x5   :  { %p130_p0 = scmp.ne.s32.totalorder %s21_s16, %s129_s19  ;;  %p135_p2 = scmp.lt.s32.totalorder %s129_s19, %s129_s19 }
   0x7   :  { %p136_p3 = por %p135_p2, %p134_p1 }
   0x9   :  { %p137_p4 = pnand %p136_p3, %p130_p0 }
   0xb   :  { %140 = shalt.err (!%p137_p4)
}
   0xc   :  { %23 = dma.hbm_to_vmem [thread:$0]  %s232_s1, 128, %s21_s16, [#allocation3]  }
   0xd   :  { %s149_s22 = scalar_lea.vmem %s31_s18, 128  ;;  %p154_p6 = scmp.lt.s32.totalorder %s31_s18, %s31_s18 }
   0xe   :  { %p150_p5 = scmp.ne.s32.totalorder %s31_s18, %s149_s22  ;;  %p155_p7 = scmp.lt.s32.totalorder %s149_s22, %s149_s22 }
  0x10   :  { %p156_p8 = por %p155_p7, %p154_p6 }
  0x12   :  { %p157_p9 = pnand %p156_p8, %p150_p5 }
  0x14   :  { %160 = shalt.err (!%p157_p9)
}
  0x15   :  { %33 = dma.hbm_to_vmem [thread:$0]  %s233_s2, 128, %s31_s18, [#allocation6]  }
  0x16   :  { %181 = dma.done.wait [#allocation3], 128  }
  0x17   :  { %182 = vsyncadd [#allocation3], 4294967168 }
  0x18   :  { %183 = dma.done.wait [#allocation6], 128  }
  0x19   :  { %184 = vsyncadd [#allocation6], 4294967168  ;;  %v42_v0 = vld [vmem:[%s231_s0] sm:$0xff]  ;;  %v44_v1 = vld [vmem:[#allocation5] sm:$0xff]  ;;  %vm55_vm0 = vcmask 261120   ;;  %v189_v9 = vmov 0  }
  0x1a   :  { %v43_v2 = vld [vmem:[#allocation2] sm:$0xff]  ;;  %v60_v3 = vsub.f32 %v42_v0, %v44_v1  ;;  %117 = vset.pattern.permute.xlu1 %v189_v9  ;;  %118 = vset.pattern.permute.xlu0 %v189_v9  ;;  %vm83_vm3 = vcmask 7168   ;;  %s190_s0 = smov [#allocation7]  }
  0x1b   :  { %v53_v4 = vsub.f32 %v42_v0, %v43_v2  ;;  %v47_v11 = vld [vmem:[%s234_s3] sm:$0xff]  ;;  %s103_s3 = sshll.u32 %s190_s0, 4  ;;  %s104_s3 = int_to_ptr.vmem [resolvable:$true] %s103_s3 }
  0x1c   :  { %v61_v5 = vmul.f32 %v60_v3, %v60_v3  ;;  %v75_v14 = vsub.f32 1.0, %v47_v11  ;;  %v78_v20 = vmul.f32 0.5, %v47_v11  ;;  %s161_s27 = scalar_lea.vmem %s104_s3, 128  ;;  %p166_p11 = scmp.lt.s32.totalorder %s104_s3, %s104_s3 }
  0x1d   :  { %v54_v6 = vmul.f32 %v53_v4, %v53_v4  ;;  %p162_p10 = scmp.ne.s32.totalorder %s104_s3, %s161_s27  ;;  %p167_p12 = scmp.lt.s32.totalorder %s161_s27, %s161_s27 }
  0x1e   :  { %v62_v7 = vsel %vm55_vm0, %v61_v5, 0.0  ;;  %v76_v19 = vmul.f32 0.5, %v75_v14 }
  0x1f   :  { %63 = vadd.xlane.f32.xlu0 %v62_v7  ;;  %v56_v8 = vsel %vm55_vm0, %v54_v6, 0.0  ;;  %p168_p13 = por %p167_p12, %p166_p11 }
  0x21   :  { %p169_p0 = pnand %p168_p13, %p162_p10 }
  0x23   :  { %57 = vadd.xlane.f32.xlu0 %v56_v8 }
  0xa8   :  { %v64_v10 = vpop.xlane.xlu0 %63 }
  0xa9   :  { %119 = vrsqrt.f32 %v64_v10  ;;  %vm68_vm1 = vcmp.eq.f32.partialorder %v64_v10, inf  ;;  %v71_v15 = vand.u32 2147483648, %v64_v10  ;;  %vm70_vm2 = vcmp.eq.f32.partialorder %v64_v10, 0.0 }
  0xac   :  { %v58_v21 = vpop.xlane.xlu0 %57 }
  0xad   :  { %v77_v24 = vmul.f32 %v76_v19, %v58_v21 }
  0xb6   :  { %v120_v12 = vpop.eup %119 }
  0xb7   :  { %v67_v13 = vmul.f32 %v120_v12, %v64_v10 }
  0xb9   :  { %v69_v16 = vsel %vm68_vm1, %v64_v10, %v67_v13 }
  0xba   :  { %v72_v17 = vsel %vm70_vm2, %v71_v15, %v69_v16 }
  0xbb   :  { %v73_v18 = vsub.f32 1.0, %v72_v17 }
  0xbd   :  { %v74_v22 = vmax.f32 %v73_v18, 0.0 }
  0xbf   :  { %v79_v23 = vmul.f32 %v78_v20, %v74_v22 }
  0xc1   :  { %v80_v25 = vmul.f32 %v79_v23, %v74_v22 }
  0xc3   :  { %v81_v26 = vadd.f32 %v80_v25, %v77_v24 }
  0xc5   :  { %v84_v27 = vsel %vm83_vm3, %v81_v26, 0.0 }
  0xc6   :  { %v85_v28 = vrot.slane %v84_v27, 4 }
  0xc8   :  { %v86_v29 = vadd.f32 %v85_v28, %v84_v27 }
  0xca   :  { %v87_v30 = vrot.slane %v86_v29, 2 }
  0xcc   :  { %v88_v31 = vadd.f32 %v87_v30, %v86_v29 }
  0xce   :  { %v89_v32 = vrot.slane %v88_v31, 1 }
  0xd0   :  { %v90_v33 = vadd.f32 %v89_v32, %v88_v31 }
  0xd2   :  { %93 = vperm.xlu1 %117, %v90_v33  }
 0x14d   :  { %v94_v34 = vpop.permute.xlu1 %93 }
 0x14e   :  { %96 = vst [vmem:[#allocation7] sm:$0xff] %v94_v34 }
 0x14f   :  { %172 = shalt.err (!%p169_p0)
}
 0x150   :  { %106 = dma.vmem_to_hbm [thread:$0]  %s104_s3, 128, %s235_s4, [#allocation4]  }
 0x151   :  { %185 = dma.done.wait [#allocation4], 128  }
 0x152   :  { %186 = vsyncadd [#allocation4], 4294967168 }
 0x153   :  { %110 = vsyncpa [#allocation3], 1 }
 0x154   :  { %111 = vsyncpa [#allocation6], 1 }
 0x155   :  { %112 = vsyncpa [#allocation4], 1 }

</bundles_post_ra>
